<compile_context>
chip_gen: v6e
topology: v6e:2x2x1
jax: 0.10.0
libtpu: 0.0.40
codegen_flags: <defaults>
</compile_context>

<pallas_src>
import numpy as np
import jax
import jax.numpy as jnp
from jax.experimental import pallas as pl
from jax.experimental.pallas import tpu as pltpu


# -----------------------------------------------------------------------------
# Glue: sinusoidal timestep embedding (matches get_timestep_embedding)
# -----------------------------------------------------------------------------
def get_timestep_embedding(timesteps, embedding_dim):
    half_dim = embedding_dim // 2
    emb_factor = np.log(10000.0) / (half_dim - 1)
    emb = jnp.exp(jnp.arange(half_dim, dtype=jnp.float32) * -emb_factor)
    emb = timesteps.astype(jnp.float32)[:, None] * emb[None, :]
    emb = jnp.concatenate([jnp.sin(emb), jnp.cos(emb)], axis=1)
    if embedding_dim % 2 == 1:
        emb = jnp.pad(emb, ((0, 0), (0, 1)))
    return emb


def _diffusion_glue(x0, key, T, beta_start, beta_end, time_emb_dim):
    """Schedule buffers, t sampling, noise, t_emb  (pure-JAX glue)."""
    B = x0.shape[0]
    betas = jnp.linspace(beta_start, beta_end, T, dtype=jnp.float32)
    alphas = 1.0 - betas
    alpha_bars = jnp.cumprod(alphas)

    k_t, k_noise = jax.random.split(key)
    t = jax.random.randint(k_t, (B,), 0, T)
    alpha_bar = alpha_bars[t][:, None]                    # [B, 1]
    sqrt_ab = jnp.sqrt(alpha_bar)
    sqrt_1mab = jnp.sqrt(1.0 - alpha_bar)
    noise = jax.random.normal(k_noise, x0.shape, dtype=jnp.float32)
    t_emb = get_timestep_embedding(t, time_emb_dim)       # [B, time_emb_dim]
    return noise, sqrt_ab, sqrt_1mab, t_emb


# -----------------------------------------------------------------------------
# Pallas kernel: x_t mixing + split-W1 MLP (bf16 MXU) + MSE accumulation
# -----------------------------------------------------------------------------
def _make_diffusion_loss_kernel(inv_n):
    def kernel(x0_ref, noise_ref, sab_ref, somab_ref, ce_ref,
               w1x_ref, w1c_ref, b1_ref, w2_ref, b2_ref, w3_ref, b3_ref,
               loss_ref, sse_ref):
        i = pl.program_id(0)

        @pl.when(i == 0)
        def _init():
            sse_ref[0] = 0.0

        x0 = x0_ref[...]
        noise = noise_ref[...]
        # x_t = sqrt(alpha_bar)*x0 + sqrt(1-alpha_bar)*noise   (f32 on VPU)
        x_t = sab_ref[...] * x0 + somab_ref[...] * noise

        # Split-W1 MLP (no in-kernel concat): bf16 operands, f32 accumulate.
        h1 = (jnp.dot(x_t.astype(jnp.bfloat16), w1x_ref[...],
                      preferred_element_type=jnp.float32)
              + jnp.dot(ce_ref[...].astype(jnp.bfloat16), w1c_ref[...],
                        preferred_element_type=jnp.float32)
              + b1_ref[...])
        h1 = jnp.maximum(h1, 0.0)
        h2 = jnp.dot(h1.astype(jnp.bfloat16), w2_ref[...],
                     preferred_element_type=jnp.float32) + b2_ref[...]
        h2 = jnp.maximum(h2, 0.0)
        pred = jnp.dot(h2.astype(jnp.bfloat16), w3_ref[...],
                       preferred_element_type=jnp.float32) + b3_ref[...]

        # Running sum of squared error in SMEM (f32).
        diff = pred - noise
        sse_ref[0] += jnp.sum(diff * diff)

        @pl.when(i == pl.num_programs(0) - 1)
        def _finalize():
            loss_ref[0, 0] = sse_ref[0] * inv_n
    return kernel


# -----------------------------------------------------------------------------
# Wrapper
# -----------------------------------------------------------------------------
def conditional_diffusion_forward(x0, condition, params, key,
                                  T=100, beta_start=1e-4, beta_end=0.02,
                                  time_emb_dim=16, tile_b=None):
    """Mirrors ConditionalDiffusion.forward(x0, condition) -> scalar MSE loss."""
    B, output_dim = x0.shape
    noise, sqrt_ab, sqrt_1mab, t_emb = _diffusion_glue(
        x0, key, T, beta_start, beta_end, time_emb_dim)

    # Glue concat of [condition, t_emb] (pure layout work, done once in XLA).
    cond_emb = jnp.concatenate([condition.astype(jnp.float32), t_emb], axis=1)
    ce_dim = cond_emb.shape[1]

    # Broadcast (B,1) scales to (B, output_dim) in the wrapper (free XLA work,
    # avoids masked (B,1) loads + in-kernel broadcast).
    sab_b = jnp.broadcast_to(sqrt_ab, (B, output_dim)).astype(jnp.float32)
    somab_b = jnp.broadcast_to(sqrt_1mab, (B, output_dim)).astype(jnp.float32)

    w1, b1, w2, b2, w3, b3 = params
    H = w2.shape[0]
    # Split W1 so the kernel never concatenates along the lane axis.
    w1x = w1[:output_dim].astype(jnp.bfloat16)     # [output_dim, H]
    w1c = w1[output_dim:].astype(jnp.bfloat16)     # [ncon+time_emb_dim, H]
    w2b = w2.astype(jnp.bfloat16)
    w3b = w3.astype(jnp.bfloat16)
    b1f, b2f, b3f = (b.astype(jnp.float32) for b in (b1, b2, b3))

    if tile_b is None:
        # Tiny here; for large B grow tile_b toward the VMEM budget
        # (note v7x has 64 MiB VMEM/TC vs 128 MiB on v5e/v6e).
        tile_b = 8 if B % 8 == 0 else B
    assert B % tile_b == 0, "batch must be divisible by tile_b"
    grid = (B // tile_b,)

    def batch_spec(d):
        return pl.BlockSpec((tile_b, d), lambda i: (i, 0))

    def resident(arr):
        # Constant block index -> stays VMEM resident across all grid steps.
        return pl.BlockSpec(arr.shape, lambda i: (0, 0))

    in_dim = output_dim + ce_dim
    flops = 2 * B * (in_dim * H + H * H + H * output_dim)
    bytes_accessed = int(
        4 * B * output_dim * 4          # x0, noise, sab, somab (f32)
        + B * ce_dim * 4                # cond_emb (f32)
        + (in_dim * H + H * H + H * output_dim) * 2   # bf16 weights
        + (2 * H + output_dim) * 4      # biases
        + 4)                            # scalar loss

    kernel = _make_diffusion_loss_kernel(inv_n=1.0 / float(B * output_dim))

    loss = pl.pallas_call(
        kernel,
        out_shape=jax.ShapeDtypeStruct((1, 1), jnp.float32),
        grid_spec=pltpu.PrefetchScalarGridSpec(
            num_scalar_prefetch=0,
            grid=grid,
            in_specs=[
                batch_spec(output_dim),     # x0
                batch_spec(output_dim),     # noise
                batch_spec(output_dim),     # sqrt(alpha_bar)
                batch_spec(output_dim),     # sqrt(1 - alpha_bar)
                batch_spec(ce_dim),         # [condition, t_emb]
                resident(w1x), resident(w1c), resident(b1f),
                resident(w2b), resident(b2f),
                resident(w3b), resident(b3f),
            ],
            out_specs=pl.BlockSpec((1, 1), lambda i: (0, 0),
                                   memory_space=pltpu.MemorySpace.SMEM),
            scratch_shapes=[pltpu.SMEM((1,), jnp.float32)],
        ),
        # Batch axis carries the loss accumulator -> "arbitrary".
        # TODO(synk): a two-pass finalize would let this axis be "parallel" on
        # v7x's 2 TCs; single-pass accumulation must stay sequential.
        compiler_params=pltpu.CompilerParams(
            dimension_semantics=("arbitrary",)),
        cost_estimate=pl.CostEstimate(flops=flops, transcendentals=0,
                                      bytes_accessed=bytes_accessed),
    )(x0.astype(jnp.float32), noise, sab_b, somab_b, cond_emb,
      w1x, w1c, b1f, w2b, b2f, w3b, b3f)
    return loss[0, 0]


# Pure-JAX reference (same glue / randomness) for a correctness check.
def conditional_diffusion_forward_ref(x0, condition, params, key,
                                      T=100, beta_start=1e-4, beta_end=0.02,
                                      time_emb_dim=16):
    noise, sqrt_ab, sqrt_1mab, t_emb = _diffusion_glue(
        x0, key, T, beta_start, beta_end, time_emb_dim)
    x_t = sqrt_ab * x0 + sqrt_1mab * noise
    inp = jnp.concatenate([x_t, condition.astype(jnp.float32), t_emb], axis=1)
    w1, b1, w2, b2, w3, b3 = params
    h1 = jnp.maximum(inp @ w1 + b1, 0.0)
    h2 = jnp.maximum(h1 @ w2 + b2, 0.0)
    pred = h2 @ w3 + b3
    return jnp.mean((pred - noise) ** 2)


# -----------------------------------------------------------------------------
# Deterministic parameter init (PyTorch nn.Linear-style uniform)
# -----------------------------------------------------------------------------
def init_params(key, input_dim, hidden_dim, output_dim):
    def linear(k, fan_in, fan_out):
        kw, kb = jax.random.split(k)
        bound = 1.0 / np.sqrt(fan_in)
        # stored as [fan_in, fan_out] so the kernel does x @ W + b
        w = jax.random.uniform(kw, (fan_in, fan_out), jnp.float32, -bound, bound)
        b = jax.random.uniform(kb, (1, fan_out), jnp.float32, -bound, bound)
        return w, b

    k1, k2, k3 = jax.random.split(key, 3)
    w1, b1 = linear(k1, input_dim, hidden_dim)
    w2, b2 = linear(k2, hidden_dim, hidden_dim)
    w3, b3 = linear(k3, hidden_dim, output_dim)
    return (w1, b1, w2, b2, w3, b3)


if __name__ == "__main__":
    # Module defaults: output_dim=3, ncon=16, time_emb_dim=16 -> MLP input = 35
    batch = 32
    output_dim = 3
    ncon = 16
    time_emb_dim = 16
    hidden_dim = 128
    mlp_input_dim = output_dim + ncon + time_emb_dim

    root = jax.random.PRNGKey(0)
    k_params, k_x0, k_cond, k_fwd = jax.random.split(root, 4)

    params = init_params(k_params, mlp_input_dim, hidden_dim, output_dim)
    x0 = jax.random.normal(k_x0, (batch, output_dim), dtype=jnp.float32)
    condition = jax.random.normal(k_cond, (batch, ncon), dtype=jnp.float32)

    loss = conditional_diffusion_forward(
        x0, condition, params, k_fwd,
        T=100, beta_start=1e-4, beta_end=0.02, time_emb_dim=time_emb_dim,
        tile_b=8,  # grid of 4 steps exercises the cross-tile MSE accumulation
    )
    loss = jax.block_until_ready(loss)

    ref = conditional_diffusion_forward_ref(
        x0, condition, params, k_fwd,
        T=100, beta_start=1e-4, beta_end=0.02, time_emb_dim=time_emb_dim)
    ref = jax.block_until_ready(ref)

    assert jnp.isfinite(loss), "loss is not finite"
    # bf16 MXU operands vs f32 reference -> loose tolerance
    assert abs(float(loss) - float(ref)) < 3e-2 * max(1.0, abs(float(ref))), (
        f"kernel loss {float(loss)} vs ref {float(ref)}")
    print("KERNEL_OK")
</pallas_src>

<mosaic_0001>
module attributes {stable_mosaic.version = 11 : i64} {
  func.func @kernel(%arg0: i32, %arg1: memref<8x3xf32, #tpu.memory_space<vmem>>, %arg2: memref<8x3xf32, #tpu.memory_space<vmem>>, %arg3: memref<8x3xf32, #tpu.memory_space<vmem>>, %arg4: memref<8x3xf32, #tpu.memory_space<vmem>>, %arg5: memref<8x32xf32, #tpu.memory_space<vmem>>, %arg6: memref<3x128xbf16, #tpu.memory_space<vmem>>, %arg7: memref<32x128xbf16, #tpu.memory_space<vmem>>, %arg8: memref<1x128xf32, #tpu.memory_space<vmem>>, %arg9: memref<128x128xbf16, #tpu.memory_space<vmem>>, %arg10: memref<1x128xf32, #tpu.memory_space<vmem>>, %arg11: memref<128x3xbf16, #tpu.memory_space<vmem>>, %arg12: memref<1x3xf32, #tpu.memory_space<vmem>>, %arg13: memref<1x1xf32, #tpu.memory_space<smem>>, %arg14: memref<1xf32, #tpu.memory_space<smem>>) attributes {dimension_semantics = [#tpu.dimension_semantics<arbitrary>], iteration_bounds = array<i64: 4>, scalar_prefetch = 0 : i64, scratch_operands = 1 : i64, tpu.core_type = #tpu.core_type<tc>, window_params = [{transform_indices = @transform_0, window_bounds = array<i64: 8, 3>}, {transform_indices = @transform_1, window_bounds = array<i64: 8, 3>}, {transform_indices = @transform_2, window_bounds = array<i64: 8, 3>}, {transform_indices = @transform_3, window_bounds = array<i64: 8, 3>}, {transform_indices = @transform_4, window_bounds = array<i64: 8, 32>}, {pipeline_mode = #tpu.pipeline_mode<synchronous>, transform_indices = @transform_5, window_bounds = array<i64: 3, 128>}, {pipeline_mode = #tpu.pipeline_mode<synchronous>, transform_indices = @transform_6, window_bounds = array<i64: 32, 128>}, {pipeline_mode = #tpu.pipeline_mode<synchronous>, transform_indices = @transform_7, window_bounds = array<i64: 1, 128>}, {pipeline_mode = #tpu.pipeline_mode<synchronous>, transform_indices = @transform_8, window_bounds = array<i64: 128, 128>}, {pipeline_mode = #tpu.pipeline_mode<synchronous>, transform_indices = @transform_9, window_bounds = array<i64: 1, 128>}, {pipeline_mode = #tpu.pipeline_mode<synchronous>, transform_indices = @transform_10, window_bounds = array<i64: 128, 3>}, {pipeline_mode = #tpu.pipeline_mode<synchronous>, transform_indices = @transform_11, window_bounds = array<i64: 1, 3>}, {transform_indices = @transform_12, window_bounds = array<i64: 1, 1>}]} {
    %c0_i32 = arith.constant 0 : i32
    %0 = arith.cmpi eq, %arg0, %c0_i32 : i32
    %1 = arith.extui %0 : i1 to i32
    %c0_i32_0 = arith.constant 0 : i32
    %2 = arith.cmpi ne, %1, %c0_i32_0 : i32
    scf.if %2 {
      %cst_33 = arith.constant 0.000000e+00 : f32
      %c0_34 = arith.constant 0 : index
      %49 = memref.load %arg14[%c0_34] : memref<1xf32, #tpu.memory_space<smem>>
      memref.store %cst_33, %arg14[%c0_34] : memref<1xf32, #tpu.memory_space<smem>>
    } else {
    }
    %c0 = arith.constant 0 : index
    %c0_1 = arith.constant 0 : index
    %3 = vector.load %arg1[%c0, %c0_1] : memref<8x3xf32, #tpu.memory_space<vmem>>, vector<8x3xf32>
    %c0_2 = arith.constant 0 : index
    %c0_3 = arith.constant 0 : index
    %4 = vector.load %arg2[%c0_2, %c0_3] : memref<8x3xf32, #tpu.memory_space<vmem>>, vector<8x3xf32>
    %c0_4 = arith.constant 0 : index
    %c0_5 = arith.constant 0 : index
    %5 = vector.load %arg3[%c0_4, %c0_5] : memref<8x3xf32, #tpu.memory_space<vmem>>, vector<8x3xf32>
    %6 = arith.mulf %5, %3 : vector<8x3xf32>
    %c0_6 = arith.constant 0 : index
    %c0_7 = arith.constant 0 : index
    %7 = vector.load %arg4[%c0_6, %c0_7] : memref<8x3xf32, #tpu.memory_space<vmem>>, vector<8x3xf32>
    %8 = arith.mulf %7, %4 : vector<8x3xf32>
    %9 = arith.addf %6, %8 : vector<8x3xf32>
    %10 = arith.truncf %9 : vector<8x3xf32> to vector<8x3xbf16>
    %c0_8 = arith.constant 0 : index
    %c0_9 = arith.constant 0 : index
    %11 = vector.load %arg6[%c0_8, %c0_9] : memref<3x128xbf16, #tpu.memory_space<vmem>>, vector<3x128xbf16>
    %cst = arith.constant dense<0.000000e+00> : vector<8x128xf32>
    %12 = tpu.matmul %10, %11, %cst {dimension_numbers = #tpu.dot_dimension_numbers<[1], [0], [0], [1], [0, 0, 1, 1], [], []>} : vector<8x3xbf16>, vector<3x128xbf16>, vector<8x128xf32> -> vector<8x128xf32>
    %c0_10 = arith.constant 0 : index
    %c0_11 = arith.constant 0 : index
    %13 = vector.load %arg5[%c0_10, %c0_11] : memref<8x32xf32, #tpu.memory_space<vmem>>, vector<8x32xf32>
    %14 = arith.truncf %13 : vector<8x32xf32> to vector<8x32xbf16>
    %c0_12 = arith.constant 0 : index
    %c0_13 = arith.constant 0 : index
    %15 = vector.load %arg7[%c0_12, %c0_13] : memref<32x128xbf16, #tpu.memory_space<vmem>>, vector<32x128xbf16>
    %cst_14 = arith.constant dense<0.000000e+00> : vector<8x128xf32>
    %16 = tpu.matmul %14, %15, %cst_14 {dimension_numbers = #tpu.dot_dimension_numbers<[1], [0], [0], [1], [0, 0, 1, 1], [], []>} : vector<8x32xbf16>, vector<32x128xbf16>, vector<8x128xf32> -> vector<8x128xf32>
    %17 = arith.addf %12, %16 : vector<8x128xf32>
    %c0_15 = arith.constant 0 : index
    %c0_16 = arith.constant 0 : index
    %18 = vector.load %arg8[%c0_15, %c0_16] : memref<1x128xf32, #tpu.memory_space<vmem>>, vector<1x128xf32>
    %19 = vector.broadcast %18 : vector<1x128xf32> to vector<8x128xf32>
    %20 = arith.addf %17, %19 : vector<8x128xf32>
    %cst_17 = arith.constant 0.000000e+00 : f32
    %21 = vector.broadcast %cst_17 : f32 to vector<8x128xf32>
    %22 = arith.maximumf %20, %21 : vector<8x128xf32>
    %23 = arith.truncf %22 : vector<8x128xf32> to vector<8x128xbf16>
    %c0_18 = arith.constant 0 : index
    %c0_19 = arith.constant 0 : index
    %24 = vector.load %arg9[%c0_18, %c0_19] : memref<128x128xbf16, #tpu.memory_space<vmem>>, vector<128x128xbf16>
    %cst_20 = arith.constant dense<0.000000e+00> : vector<8x128xf32>
    %25 = tpu.matmul %23, %24, %cst_20 {dimension_numbers = #tpu.dot_dimension_numbers<[1], [0], [0], [1], [0, 0, 1, 1], [], []>} : vector<8x128xbf16>, vector<128x128xbf16>, vector<8x128xf32> -> vector<8x128xf32>
    %c0_21 = arith.constant 0 : index
    %c0_22 = arith.constant 0 : index
    %26 = vector.load %arg10[%c0_21, %c0_22] : memref<1x128xf32, #tpu.memory_space<vmem>>, vector<1x128xf32>
    %27 = vector.broadcast %26 : vector<1x128xf32> to vector<8x128xf32>
    %28 = arith.addf %25, %27 : vector<8x128xf32>
    %cst_23 = arith.constant 0.000000e+00 : f32
    %29 = vector.broadcast %cst_23 : f32 to vector<8x128xf32>
    %30 = arith.maximumf %28, %29 : vector<8x128xf32>
    %31 = arith.truncf %30 : vector<8x128xf32> to vector<8x128xbf16>
    %c0_24 = arith.constant 0 : index
    %c0_25 = arith.constant 0 : index
    %32 = vector.load %arg11[%c0_24, %c0_25] : memref<128x3xbf16, #tpu.memory_space<vmem>>, vector<128x3xbf16>
    %cst_26 = arith.constant dense<0.000000e+00> : vector<8x3xf32>
    %33 = tpu.matmul %31, %32, %cst_26 {dimension_numbers = #tpu.dot_dimension_numbers<[1], [0], [0], [1], [0, 0, 1, 1], [], []>} : vector<8x128xbf16>, vector<128x3xbf16>, vector<8x3xf32> -> vector<8x3xf32>
    %c0_27 = arith.constant 0 : index
    %c0_28 = arith.constant 0 : index
    %34 = vector.load %arg12[%c0_27, %c0_28] : memref<1x3xf32, #tpu.memory_space<vmem>>, vector<1x3xf32>
    %35 = vector.broadcast %34 : vector<1x3xf32> to vector<8x3xf32>
    %36 = arith.addf %33, %35 : vector<8x3xf32>
    %37 = arith.subf %36, %4 : vector<8x3xf32>
    %c0_29 = arith.constant 0 : index
    %38 = memref.load %arg14[%c0_29] : memref<1xf32, #tpu.memory_space<smem>>
    %39 = arith.mulf %37, %37 : vector<8x3xf32>
    %40 = vector.shape_cast %39 : vector<8x3xf32> to vector<1x8x3xf32>
    %cst_30 = arith.constant dense<0.000000e+00> : vector<1xf32>
    %41 = vector.multi_reduction <add>, %40, %cst_30 [1, 2] : vector<1x8x3xf32> to vector<1xf32>
    %42 = vector.shape_cast %41 : vector<1xf32> to vector<1x1x1xf32>
    %43 = vector.extract %42[0, 0, 0] : f32 from vector<1x1x1xf32>
    %44 = arith.addf %38, %43 : f32
    %c0_31 = arith.constant 0 : index
    %45 = memref.load %arg14[%c0_31] : memref<1xf32, #tpu.memory_space<smem>>
    memref.store %44, %arg14[%c0_31] : memref<1xf32, #tpu.memory_space<smem>>
    %c3_i32 = arith.constant 3 : i32
    %46 = arith.cmpi eq, %arg0, %c3_i32 : i32
    %47 = arith.extui %46 : i1 to i32
    %c0_i32_32 = arith.constant 0 : i32
    %48 = arith.cmpi ne, %47, %c0_i32_32 : i32
    scf.if %48 {
      %c0_33 = arith.constant 0 : index
      %49 = memref.load %arg14[%c0_33] : memref<1xf32, #tpu.memory_space<smem>>
      %cst_34 = arith.constant 0.010416667 : f32
      %50 = arith.mulf %49, %cst_34 : f32
      %c0_35 = arith.constant 0 : index
      %c0_36 = arith.constant 0 : index
      %51 = memref.load %arg13[%c0_35, %c0_36] : memref<1x1xf32, #tpu.memory_space<smem>>
      memref.store %50, %arg13[%c0_35, %c0_36] : memref<1x1xf32, #tpu.memory_space<smem>>
    } else {
    }
    return
  }
  func.func @transform_0(%arg0: i32) -> (i32, i32) {
    %c0_i32 = arith.constant 0 : i32
    %c0_i32_0 = arith.constant 0 : i32
    return %arg0, %c0_i32 : i32, i32
  }
  func.func @transform_1(%arg0: i32) -> (i32, i32) {
    %c0_i32 = arith.constant 0 : i32
    %c0_i32_0 = arith.constant 0 : i32
    return %arg0, %c0_i32 : i32, i32
  }
  func.func @transform_2(%arg0: i32) -> (i32, i32) {
    %c0_i32 = arith.constant 0 : i32
    %c0_i32_0 = arith.constant 0 : i32
    return %arg0, %c0_i32 : i32, i32
  }
  func.func @transform_3(%arg0: i32) -> (i32, i32) {
    %c0_i32 = arith.constant 0 : i32
    %c0_i32_0 = arith.constant 0 : i32
    return %arg0, %c0_i32 : i32, i32
  }
  func.func @transform_4(%arg0: i32) -> (i32, i32) {
    %c0_i32 = arith.constant 0 : i32
    %c0_i32_0 = arith.constant 0 : i32
    return %arg0, %c0_i32 : i32, i32
  }
  func.func @transform_5(%arg0: i32) -> (i32, i32) {
    %c0_i32 = arith.constant 0 : i32
    %c0_i32_0 = arith.constant 0 : i32
    %c0_i32_1 = arith.constant 0 : i32
    return %c0_i32, %c0_i32_0 : i32, i32
  }
  func.func @transform_6(%arg0: i32) -> (i32, i32) {
    %c0_i32 = arith.constant 0 : i32
    %c0_i32_0 = arith.constant 0 : i32
    %c0_i32_1 = arith.constant 0 : i32
    return %c0_i32, %c0_i32_0 : i32, i32
  }
  func.func @transform_7(%arg0: i32) -> (i32, i32) {
    %c0_i32 = arith.constant 0 : i32
    %c0_i32_0 = arith.constant 0 : i32
    %c0_i32_1 = arith.constant 0 : i32
    return %c0_i32, %c0_i32_0 : i32, i32
  }
  func.func @transform_8(%arg0: i32) -> (i32, i32) {
    %c0_i32 = arith.constant 0 : i32
    %c0_i32_0 = arith.constant 0 : i32
    %c0_i32_1 = arith.constant 0 : i32
    return %c0_i32, %c0_i32_0 : i32, i32
  }
  func.func @transform_9(%arg0: i32) -> (i32, i32) {
    %c0_i32 = arith.constant 0 : i32
    %c0_i32_0 = arith.constant 0 : i32
    %c0_i32_1 = arith.constant 0 : i32
    return %c0_i32, %c0_i32_0 : i32, i32
  }
  func.func @transform_10(%arg0: i32) -> (i32, i32) {
    %c0_i32 = arith.constant 0 : i32
    %c0_i32_0 = arith.constant 0 : i32
    %c0_i32_1 = arith.constant 0 : i32
    return %c0_i32, %c0_i32_0 : i32, i32
  }
  func.func @transform_11(%arg0: i32) -> (i32, i32) {
    %c0_i32 = arith.constant 0 : i32
    %c0_i32_0 = arith.constant 0 : i32
    %c0_i32_1 = arith.constant 0 : i32
    return %c0_i32, %c0_i32_0 : i32, i32
  }
  func.func @transform_12(%arg0: i32) -> (i32, i32) {
    %c0_i32 = arith.constant 0 : i32
    %c0_i32_0 = arith.constant 0 : i32
    %c0_i32_1 = arith.constant 0 : i32
    return %c0_i32, %c0_i32_0 : i32, i32
  }
}

</mosaic_0001>

<bundles_post_ra>
// kernel: tpu_custom_call.1
= control target key start
LH: loop header
LB: loop body
LE: loop exit
PB: predicated region body
PF: predicated region fallthrough
CT: control target
= control target key end

     0   :  { %17 = vsyncpa [#allocation4], 0  ;;  %s1197_s21 = smov 0   ;;  %s1331_s0 = inlined_call_operand.vmem [shape: f32[32,3], index: 0, kind: input, shape index: {}]   ;;  %s1332_s1 = inlined_call_operand.vmem [shape: f32[32,3], index: 1, kind: input, shape index: {}]   ;;  %s1333_s2 = inlined_call_operand.vmem [shape: f32[32,3], index: 2, kind: input, shape index: {}]   ;;  %s1334_s3 = inlined_call_operand.vmem [shape: f32[32,3], index: 3, kind: input, shape index: {}]   ;;  %s1335_s4 = inlined_call_operand.vmem [shape: f32[32,32], index: 4, kind: input, shape index: {}]   ;;  %s1336_s5 = inlined_call_operand.vmem [shape: bf16[3,128], index: 5, kind: input, shape index: {}]   ;;  %s1337_s6 = inlined_call_operand.vmem [shape: bf16[32,128], index: 6, kind: input, shape index: {}]   ;;  %s1338_s7 = inlined_call_operand.vmem [shape: f32[1,128], index: 7, kind: input, shape index: {}]   ;;  %s1339_s8 = inlined_call_operand.vmem [shape: bf16[128,128], index: 8, kind: input, shape index: {}]   ;;  %s1340_s9 = inlined_call_operand.vmem [shape: f32[1,128], index: 9, kind: input, shape index: {}]   ;;  %s1341_s10 = inlined_call_operand.vmem [shape: bf16[128,3], index: 10, kind: input, shape index: {}]   ;;  %s1342_s11 = inlined_call_operand.vmem [shape: f32[1,3], index: 11, kind: input, shape index: {}]   ;;  %s1343_s12 = inlined_call_operand.hbm [shape: f32[1,1], index: 12, kind: output, shape index: {}]  }
   0x1 LB: > { %s1203_s22 = sadd.s32 4294967295, %s1125_s21   ;;  %p948_p0 = scmp.ge.s32.totalorder %s1125_s21, 1  ;;  %s1125_s21 = sphi %s1197_s21, %s23_s21  }
   0x2   : > { %p393_p1 = scmp.lt.s32.totalorder %s1125_s21, 5 }
   0x4   : > { %p394_p2 = pnand %p948_p0, %p393_p1 }
   0x5   : > { %p445_p3 = scmp.lt.s32.totalorder (!%p394_p2), %s1203_s22, 3  ;;  %p1070_p4 = scmp.eq.s32.totalorder (!%p394_p2), %s1203_s22, 0 }
   0x6   : > { %397 = sbr.rel (%p394_p2) target bundleno = 836 (0x344), region = 68  ;;  %p1071_p5 = scmp.eq.s32.totalorder (!%p394_p2), %s1203_s22, 3 }
   0x7   : > { %s1131_s25 = smov (!%p394_p2), [#allocation3]  }
   0xb   : > { %v1127_v0 = vmov 0.0   ;;  %v1087_v1 = vld [vmem:[%s1337_s6 + $0x8] sm:$0xff]   ;;  %v1088_v2 = vld [vmem:[%s1337_s6] sm:$0xff]   ;;  %vm1128_vm0 = vmmov 0   ;;  %vm547_vm1 = vcmask 1040384   ;;  %vm548_vm2 = vcmask 1041408  }
   0xc   : > { %1006 = vmatprep.subr.bf16.mxu0 %v1127_v0  ;;  %1014 = vmatprep.subr.bf16.mxu1 %v1127_v0  ;;  %v480_v3 = vld [vmem:[%s1336_s5] sm:$0x3]  ;;  %s446_s29 = scalar_select %p445_p3, %s1203_s22, 3  ;;  %v1129_v4 = vmov 65535   ;;  %vm499_vm3 = vcmask 261120   ;;  %vm543_vm4 = vcmask 23552  }
   0xd   : > { %1010 = vmatprep.mubr.msk.bf16.mxu0 %vm1128_vm0, %v1127_v0  ;;  %1016 = vmatprep.mubr.msk.bf16.mxu1 %vm1128_vm0, %v1127_v0  ;;  %v549_v5 = vsel %vm547_vm1, 4294967295, %v1129_v4  ;;  %v1089_v16 = vld [vmem:[%s1339_s8 + $0x38] sm:$0xff]   ;;  %v1090_v19 = vld [vmem:[%s1339_s8 + $0x30] sm:$0xff]   ;;  %v1091_v20 = vld [vmem:[%s1339_s8 + $0x28] sm:$0xff]  }
   0xe   : > { %1007 = vmatpush3.bf16.msra.mxu0 %v1087_v1  ;;  %v550_v6 = vsel %vm548_vm2, %v549_v5, 0  ;;  %s949_s30 = sshll.u32 %s446_s29, 3  ;;  %v1092_v21 = vld [vmem:[%s1339_s8 + $0x20] sm:$0xff]   ;;  %v1093_v22 = vld [vmem:[%s1339_s8 + $0x18] sm:$0xff]   ;;  %v1094_v23 = vld [vmem:[%s1339_s8 + $0x10] sm:$0xff]  }
   0xf   : > { %1008 = vmatprep.subr.bf16.mxu0 %v1127_v0  ;;  %v552_v7 = vand.u32 %v550_v6, %v480_v3  ;;  %s464_s15 = scalar_lea.vmem %s1335_s4, %s949_s30  ;;  %s448_s18 = scalar_lea.vmem %s1331_s0, %s949_s30  ;;  %v1095_v24 = vld [vmem:[%s1339_s8 + $0x8] sm:$0xff]   ;;  %v1096_v25 = vld [vmem:[%s1339_s8] sm:$0xff]   ;;  %v1097_v26 = vld [vmem:[%s1341_s10 + $0x38] sm:$0xff]  }
  0x10   : > { %v481_v8 = vld [vmem:[%s464_s15] sm:$0xff]  ;;  %s452_s23 = scalar_lea.vmem %s1332_s1, %s949_s30  ;;  %s456_s26 = scalar_lea.vmem %s1333_s2, %s949_s30  ;;  %v1098_v27 = vld [vmem:[%s1341_s10 + $0x30] sm:$0xff]   ;;  %v1099_v28 = vld [vmem:[%s1341_s10 + $0x28] sm:$0xff]  }
  0x11   : > { %1015 = vmatpush3.bf16.msra.mxu1 %v552_v7  ;;  %v472_v9 = vld [vmem:[%s448_s18] sm:$0xff]  ;;  %v482_v10 = vpack.c.bf16 %v481_v8, %v481_v8  ;;  %s460_s29 = scalar_lea.vmem %s1334_s3, %s949_s30  ;;  %v1101_v30 = vld [vmem:[%s1341_s10 + $0x18] sm:$0xff]   ;;  %v1102_v31 = vld [vmem:[%s1341_s10 + $0x10] sm:$0xff]   ;;  %s1130_s18 = smov 0.0  }
  0x12   : > { %1009 = vmatpush3.bf16.msra.mxu0 %v1088_v2  ;;  %v1241_v11 = vld [vmem:[%s452_s23] sm:$0xff]  ;;  %1020 = vmatprep.subr.bf16.mxu1 %v1127_v0  ;;  %v1103_v45 = vld [vmem:[%s1341_s10 + $0x8] sm:$0xff]   ;;  %1063 = sst [smem:[#allocation2]] (%p1070_p4), %s1130_s18 }
  0x13   : > { %1040 = vmatprep.subr.bf16.mxu0 %v1127_v0  ;;  %v474_v12 = vld [vmem:[%s456_s26] sm:$0xff]  ;;  %s829_s19 = sld [smem:[#allocation2]] }
  0x14   : > { %v475_v13 = vmul.f32 %v474_v12, %v472_v9  ;;  %v476_v14 = vld [vmem:[%s460_s29] sm:$0xff] }
  0x15   : > { %1011 = vmatmul.mubr.msk.bf16.vlgmr.msra.gmra.mxu0 %vm499_vm3, %v482_v10  ;;  %v477_v15 = vmul.f32 %v476_v14, %v1241_v11  ;;  %v1100_v29 = vld [vmem:[%s1341_s10 + $0x20] sm:$0xff]  }
  0x16   : > { %1056 = vmatprep.mubr.msk.bf16.mxu0 %vm1128_vm0, %v1127_v0  ;;  %1041 = vmatpush3.bf16.msra.mxu0 %v1097_v26  ;;  %v959_v36 = vld [vmem:[%s1338_s7] ss:$0 sm:$0xff] }
  0x17   : > { %v478_v17 = vadd.f32 %v477_v15, %v475_v13  ;;  %1042 = vmatprep.subr.bf16.mxu0 %v1127_v0  ;;  %v1104_v46 = vld [vmem:[%s1341_s10] sm:$0xff]  }
  0x18   : > { %v960_v47 = vld [vmem:[%s1340_s9] ss:$0 sm:$0xff] }
  0x19   : > { %v479_v18 = vpack.c.bf16 %v478_v17, %v478_v17  ;;  %v969_v55 = vld [vmem:[%s1342_s11] ss:$0 sm:$0xff] }
  0x1a   : > { %1043 = vmatpush3.bf16.msra.mxu0 %v1098_v27 }
  0x1b   : > { %1017 = vmatmul.mubr.msk.bf16.vlgmr.msra.gmra.mxu1 %vm543_vm4, %v479_v18  ;;  %1044 = vmatprep.subr.bf16.mxu0 %v1127_v0 }
  0x1c   : > { %1021 = vmatpush3.bf16.msra.mxu1 %v1089_v16  ;;  %1036 = vmatprep.mubr.msk.bf16.mxu1 %vm1128_vm0, %v1127_v0 }
  0x1d   : > { %1022 = vmatprep.subr.bf16.mxu1 %v1127_v0 }
  0x1e   : > { %1045 = vmatpush3.bf16.msra.mxu0 %v1099_v28 }
  0x1f   : > { %1046 = vmatprep.subr.bf16.mxu0 %v1127_v0 }
  0x20   : > { %1023 = vmatpush3.bf16.msra.mxu1 %v1090_v19 }
  0x21   : > { %1024 = vmatprep.subr.bf16.mxu1 %v1127_v0 }
  0x22   : > { %1047 = vmatpush3.bf16.msra.mxu0 %v1100_v29 }
  0x23   : > { %1048 = vmatprep.subr.bf16.mxu0 %v1127_v0 }
  0x24   : > { %1025 = vmatpush3.bf16.msra.mxu1 %v1091_v20 }
  0x25   : > { %1026 = vmatprep.subr.bf16.mxu1 %v1127_v0 }
  0x26   : > { %1049 = vmatpush3.bf16.msra.mxu0 %v1101_v30 }
  0x27   : > { %1050 = vmatprep.subr.bf16.mxu0 %v1127_v0 }
  0x28   : > { %1027 = vmatpush3.bf16.msra.mxu1 %v1092_v21 }
  0x29   : > { %1028 = vmatprep.subr.bf16.mxu1 %v1127_v0 }
  0x2a   : > { %1051 = vmatpush3.bf16.msra.mxu0 %v1102_v31 }
  0x2b   : > { %1052 = vmatprep.subr.bf16.mxu0 %v1127_v0 }
  0x2c   : > { %1029 = vmatpush3.bf16.msra.mxu1 %v1093_v22 }
  0x2d   : > { %1030 = vmatprep.subr.bf16.mxu1 %v1127_v0 }
  0x2e   : > { %1053 = vmatpush3.bf16.msra.mxu0 %v1103_v45 }
  0x2f   : > { %1054 = vmatprep.subr.bf16.mxu0 %v1127_v0 }
  0x30   : > { %1031 = vmatpush3.bf16.msra.mxu1 %v1094_v23 }
  0x31   : > { %1032 = vmatprep.subr.bf16.mxu1 %v1127_v0 }
  0x32   : > { %1055 = vmatpush3.bf16.msra.mxu0 %v1104_v46 }
  0x34   : > { %1033 = vmatpush3.bf16.msra.mxu1 %v1095_v24 }
  0x35   : > { %1034 = vmatprep.subr.bf16.mxu1 %v1127_v0 }
  0x38   : > { %1035 = vmatpush3.bf16.msra.mxu1 %v1096_v25 }
  0xd5   : > { %v537_v32 = vpop.f32.mrf.mxu0 }
  0xd7   : > { %v1012_v33 = vpop.f32.mrf.mxu0 }
  0xd9   : > { %v540_v34 = vpop.f32.mrf.mxu0 }
  0xdb   : > { %v588_v35 = vpop.f32.mrf.mxu1  ;;  %v1013_v37 = vpop.f32.mrf.mxu0 }
  0xdc   : > { %v589_v38 = vadd.f32 %v588_v35, %v537_v32 }
  0xdd   : > { %v1018_v39 = vpop.f32.mrf.mxu1 }
  0xde   : > { %v601_v40 = vadd.f32 %v959_v36, %v589_v38 }
  0xdf   : > { %v591_v41 = vpop.f32.mrf.mxu1 }
  0xe0   : > { %v602_v42 = vmax.f32 %v601_v40, 0.0 }
  0xe1   : > { %v1019_v43 = vpop.f32.mrf.mxu1 }
  0xe2   : > { %v603_v44 = vpack.c.bf16 %v602_v42, %v602_v42 }
  0xe4   : > { %1037 = vmatmul.mubr.bf16.vlgmr.msra.gmra.mxu1 %v603_v44 }
 0x1a4   : > { %v709_v48 = vpop.f32.mrf.mxu1 }
 0x1a5   : > { %v710_v49 = vadd.f32 %v960_v47, %v709_v48 }
 0x1a6   : > { %v1038_v50 = vpop.f32.mrf.mxu1 }
 0x1a7   : > { %v715_v51 = vmax.f32 %v710_v49, 0.0 }
 0x1a8   : > { %v712_v52 = vpop.f32.mrf.mxu1 }
 0x1a9   : > { %v716_v53 = vpack.c.bf16 %v715_v51, %v715_v51 }
 0x1aa   : > { %v1039_v54 = vpop.f32.mrf.mxu1 }
 0x1ab   : > { %1057 = vmatmul.mubr.bf16.vlgmr.msra.gmra.mxu0 %v716_v53 }
 0x26b   : > { %v822_v56 = vpop.f32.mrf.mxu0 }
 0x26c   : > { %v823_v57 = vadd.f32 %v969_v55, %v822_v56 }
 0x26d   : > { %v1058_v58 = vpop.f32.mrf.mxu0 }
 0x26e   : > { %v828_v59 = vsub.f32 %v823_v57, %v1241_v11 }
 0x26f   : > { %v825_v60 = vpop.f32.mrf.mxu0 }
 0x270   : > { %v830_v61 = vmul.f32 %v828_v59, %v828_v59 }
 0x271   : > { %v1059_v62 = vpop.f32.mrf.mxu0 }
 0x272   : > { %v831_v63 = vsel %vm543_vm4, %v830_v61, 0.0 }
 0x273   : > { %832 = vadd.xlane.f32.xlu0 %v831_v63 }
 0x2fc   : > { %v833_v0 = vpop.xlane.xlu0 %832 }
 0x2fd   : > { %v834_v1 = vrot.slane %v833_v0, 4 }
 0x2ff   : > { %v835_v2 = vadd.f32 %v834_v1, %v833_v0 }
 0x301   : > { %v836_v3 = vrot.slane %v835_v2, 2 }
 0x303   : > { %v837_v4 = vadd.f32 %v836_v3, %v835_v2 }
 0x305   : > { %v838_v5 = vrot.slane %v837_v4, 1 }
 0x307   : > { %v839_v6 = vadd.f32 %v838_v5, %v837_v4 }
 0x309   : > { %1060 = vpush %v839_v6 }
 0x33a   : > { %s1061_s20 = spop %1060 }
 0x33b   : > { %s841_s23 = sadd.f32 %s1061_s20, %s829_s19 }
 0x33d   : > { %843 = sst [smem:[#allocation2]] %s841_s23  ;;  %s849_s24 = smul.f32 0.010416667, %s841_s23 }
 0x33f   : > { %1065 = sst [smem:[#allocation3]] (%p1071_p5), %s849_s24 }
 0x340   : > { %1067 = dma.smem_to_hbm (%p1071_p5), %s1131_s25, 16, %s1343_s12, [#allocation4]  }
 0x341   : > { %1120 = dma.done.wait (%p1071_p5), [#allocation4], 16  }
 0x342   : > { %1122 = vsyncadd (%p1071_p5), [#allocation4], 4294967280 }
 0x343   : > { %865 = sfence }
 0x344 PF: > { %s23_s21 = sadd.s32 1, %s1125_s21  }
 0x345   : > { %p20_p6 = scmp.ge.s32.totalorder %s23_s21, 6  }
 0x347   :  { %22 = sbr.rel (!%p20_p6) target bundleno = 1 (0x1), region = 118 }
 0x34c   :  { %871 = vsyncpa [#allocation4], 1 }
 0x34d   :  { %873 = vsyncpa [#allocation4 + $0x1], 1 }

</bundles_post_ra>
